<compile_context>
chip_gen: v7x
topology: tpu7x:2x2x1
jax: 0.10.0
libtpu: 0.0.40
codegen_flags: <defaults>
</compile_context>

<pallas_src>
import functools

import jax
import jax.numpy as jnp
from jax.experimental import pallas as pl
from jax.experimental.pallas import tpu as pltpu


def _round_up(x, m):
    return -(-x // m) * m


def _vmem_capacity_bytes():
    """Physical VMEM of the current chip; conservative 64 MiB (v7x) fallback."""
    try:
        info = pltpu.get_tpu_info()
        cap = int(getattr(info, "vmem_capacity_bytes", 0))
        if cap > 0:
            return cap
    except Exception:
        pass
    return 64 << 20


def _footprint_bytes(tm, d, k, dtsz, cb_bufs):
    """Rough per-step VMEM footprint for a given lane tile size."""
    x_in = 2 * d * tm * dtsz                       # double-buffered activation tile
    zq_out = 2 * d * tm * dtsz                     # double-buffered quantized tile
    small_out = 2 * 2 * tm * 4                     # inds + err lane rows
    cb = cb_bufs * 2 * k * d * dtsz                # codebook + codebook^T (resident)
    w2 = cb_bufs * _round_up(k, 8) * 128 * 4       # (K,1) column, lane-padded
    temps = k * tm * (8 + dtsz) + 4 * d * tm * 4   # scores/iota/one-hot + f32 temps
    return x_in + zq_out + small_out + cb + w2 + temps


def _choose_tile(hw, d, k, dtsz, cb_bufs, vmem_cap):
    """Largest 128-multiple lane tile fitting ~70% of this chip's VMEM."""
    budget = int(0.70 * vmem_cap)
    # TM=2048 only pays off for small D on big-VMEM chips (v5e/v6e); cap at 1024 on v7x.
    max_tm = 2048 if (d <= 64 and vmem_cap > (64 << 20)) else 1024
    tm = min(max_tm, _round_up(hw, 128))
    tm = max(128, (tm // 128) * 128)
    while tm > 128 and _footprint_bytes(tm, d, k, dtsz, cb_bufs) > budget:
        tm -= 128
    return tm


def _vq_kernel(x_ref, w_ref, wt_ref, w2h_ref, zq_ref, inds_ref, err_ref,
               *, bf16_distances):
    # x_ref   : (1, D, TM) activations tile, channels on sublanes, spatial on lanes
    # w_ref   : (K, D)     codebook            (VMEM-resident, constant index_map)
    # wt_ref  : (D, K)     codebook transpose  (VMEM-resident)
    # w2h_ref : (K, 1)     0.5*||w_k||^2, f32  (precomputed in the wrapper)
    xt_in = x_ref[0]                                 # (D, TM), native dtype
    w_in = w_ref[...]                                # (K, D)
    wt_in = wt_ref[...]                              # (D, K)

    K = w_in.shape[0]
    TM = xt_in.shape[1]

    # Scaled distance scores (argmin-invariant simplifications: ||x_m||^2 dropped,
    # everything scaled by 0.5):  s[k, m] = 0.5*||w_k||^2 - <w_k, x_m>
    if bf16_distances and xt_in.dtype == jnp.float32:
        # bf16 feeds the MXU single-pass; relative ordering is all argmin needs.
        wx = jnp.dot(w_in.astype(jnp.bfloat16), xt_in.astype(jnp.bfloat16),
                     preferred_element_type=jnp.float32)                # (K, TM)
    else:
        wx = jnp.dot(w_in, xt_in, preferred_element_type=jnp.float32)   # (K, TM)
    scores = w2h_ref[...] - wx                                          # (K, TM)

    # argmin over the codebook (sublane) axis, first-match tie-break.
    # Everything stays 2-D (keepdims) to avoid 1-D relayouts.
    min_s = jnp.min(scores, axis=0, keepdims=True)                      # (1, TM)
    iota_k = jax.lax.broadcasted_iota(jnp.int32, (K, TM), 0)            # (K, TM)
    inds2d = jnp.min(jnp.where(scores <= min_s, iota_k, jnp.int32(K)),
                     axis=0, keepdims=True)                             # (1, TM)
    inds_ref[...] = inds2d[None].astype(jnp.int32)                      # (1, 1, TM)

    # One-hot codebook gather as an MXU matmul, already in (D, TM) layout so the
    # quantized output is written back directly in NCHW (no wrapper permute).
    one_hot_t = (iota_k == inds2d).astype(wt_in.dtype)                  # (K, TM)
    zq_t = jnp.dot(wt_in, one_hot_t, preferred_element_type=jnp.float32)  # (D, TM)
    zq_ref[...] = zq_t[None].astype(zq_ref.dtype)

    # Per-position squared error summed over channels; lane-dense (1, TM) row.
    diff = xt_in.astype(jnp.float32) - zq_t
    err_ref[...] = jnp.sum(diff * diff, axis=0, keepdims=True)[None]    # (1, 1, TM)


def _resident_spec(shape, single_buffer):
    """VMEM-resident (constant index_map) spec; single-buffered when it pays off."""
    index_map = lambda n, t: (0,) * len(shape)
    if single_buffer:
        try:
            # Constant block -> one buffer is enough; halves codebook VMEM.
            return pl.BlockSpec(shape, index_map, pipeline_mode=pl.Buffered(1))
        except TypeError:
            pass
    return pl.BlockSpec(shape, index_map)


def _vq_pallas(x_ncm, weight, weight_t, w2_half, tm, vmem_limit_bytes,
               single_buffer_codebook, bf16_distances):
    N, D, HWp = x_ncm.shape
    K, _ = weight.shape
    n_tiles = HWp // tm

    kernel = functools.partial(_vq_kernel, bf16_distances=bf16_distances)
    out_shapes = (
        jax.ShapeDtypeStruct((N, D, HWp), x_ncm.dtype),   # z_q (NCHW-flattened)
        jax.ShapeDtypeStruct((N, 1, HWp), jnp.int32),     # nearest-code indices
        jax.ShapeDtypeStruct((N, 1, HWp), jnp.float32),   # per-position squared error
    )
    return pl.pallas_call(
        kernel,
        out_shape=out_shapes,
        grid=(N, n_tiles),
        in_specs=[
            pl.BlockSpec((1, D, tm), lambda n, t: (n, 0, t)),
            _resident_spec((K, D), single_buffer_codebook),   # codebook
            _resident_spec((D, K), single_buffer_codebook),   # codebook^T
            _resident_spec((K, 1), single_buffer_codebook),   # 0.5*||w||^2
        ],
        out_specs=(
            pl.BlockSpec((1, D, tm), lambda n, t: (n, 0, t)),
            pl.BlockSpec((1, 1, tm), lambda n, t: (n, 0, t)),
            pl.BlockSpec((1, 1, tm), lambda n, t: (n, 0, t)),
        ),
        compiler_params=pltpu.CompilerParams(
            dimension_semantics=("parallel", "parallel"),
            vmem_limit_bytes=vmem_limit_bytes,
        ),
    )(x_ncm, weight, weight_t, w2_half)


def vq_straight_through(z_e, embedding_weight, *, bf16_distances=False):
    """Forward pass of VQ_StraightThrough.

    Args:
      z_e: (N, C, H, W) float array (NCHW, like the PyTorch conv output).
      embedding_weight: (nEmbeds, embedDim) codebook, embedDim == C.
      bf16_distances: run the distance matmul in bf16 (much faster MXU phase);
        may flip argmin on near-ties, so exact-index tests should keep it False.

    Returns:
      (z_q_nchw, vq_loss, inds) matching the PyTorch module forward:
        z_q_nchw : (N, C, H, W)   straight-through quantized output
        vq_loss  : (N,)           per-batch VQ loss (forward value)
        inds     : (N*H*W, 1)     int32 nearest-codebook indices
    """
    N, C, H, W = z_e.shape
    K, D = embedding_weight.shape
    assert C == D, "channel dim must equal embedDim"
    HW = H * W
    dtsz = jnp.dtype(z_e.dtype).itemsize

    # Single-buffer the constant codebook blocks only when double-buffering them
    # would cost real VMEM (> 4 MiB across W and W^T).
    single_buffer_codebook = (4 * K * D * dtsz) > (4 << 20)
    cb_bufs = 1 if single_buffer_codebook else 2

    vmem_cap = _vmem_capacity_bytes()
    tm = _choose_tile(HW, D, K, dtsz, cb_bufs, vmem_cap)
    footprint = _footprint_bytes(tm, D, K, dtsz, cb_bufs)
    vmem_limit = int(min(int(0.9 * vmem_cap),
                         max(32 << 20, footprint + (8 << 20))))

    # View NCHW as (N, C, H*W): free reshape (no transpose / extra HBM pass).
    # Pad the spatial axis to a multiple of the lane tile so every tile is
    # 128-lane-dense and the pipeline / megacore sharding stays intact.
    x_ncm = z_e.reshape(N, D, HW)
    hw_pad = _round_up(HW, tm)
    if hw_pad != HW:
        x_ncm = jnp.pad(x_ncm, ((0, 0), (0, 0), (0, hw_pad - HW)))

    w_t = embedding_weight.T                                           # tiny (D, K)
    w2_half = 0.5 * jnp.sum(embedding_weight.astype(jnp.float32) ** 2,
                            axis=-1, keepdims=True)                    # (K, 1) f32

    zq_ncm, inds_nc, err_nc = _vq_pallas(
        x_ncm, embedding_weight, w_t, w2_half, tm, vmem_limit,
        single_buffer_codebook, bf16_distances)

    zq_ncm = zq_ncm[:, :, :HW]
    inds_nc = inds_nc[:, :, :HW]
    err_nc = err_nc[:, :, :HW]

    z_q = zq_ncm.reshape(N, C, H, W)

    # vq_loss = mean((sg(z_e)-z_q)^2) + 0.25*mean((z_e-sg(z_q))^2);
    # the forward value collapses to 1.25 * mean((z_e - z_q)^2) per batch element.
    # TODO(synk): training-time gradients need the two-term stop_gradient form /
    # a custom_vjp around the pallas_call; this wrapper only preserves forward values.
    per_batch_sse = jnp.sum(err_nc.reshape(N, HW), axis=1)
    vq_loss = 1.25 * per_batch_sse / jnp.float32(HW * D)

    # indices in (n, h, w) row-major order -> (N*H*W, 1), like the torch module.
    inds = inds_nc.reshape(-1, 1)

    # Straight-through estimator: forward value is z_q, grad w.r.t. z_e is identity.
    z_q = z_e + jax.lax.stop_gradient(z_q - z_e)
    return z_q, vq_loss, inds


if __name__ == "__main__":
    # Module hyper-parameters (synthetic, deterministic init).
    nEmbeds = 16
    embedDim = 8

    # Small NCHW input consistent with the forward (C == embedDim).
    N, C, H, W = 2, embedDim, 8, 8

    key = jax.random.PRNGKey(0)
    k_w, k_x = jax.random.split(key)

    # nn.Embedding weight init: uniform(-1/nEmbeds, 1/nEmbeds).
    embedding_weight = jax.random.uniform(
        k_w, (nEmbeds, embedDim), dtype=jnp.float32,
        minval=-1.0 / nEmbeds, maxval=1.0 / nEmbeds)

    z_e = jax.random.normal(k_x, (N, C, H, W), dtype=jnp.float32)

    fwd = jax.jit(vq_straight_through)
    z_q, vq_loss, inds = fwd(z_e, embedding_weight)
    jax.block_until_ready((z_q, vq_loss, inds))

    # Lightweight sanity check against a pure-JAX reference.
    z_e_nhwc = jnp.transpose(z_e, (0, 2, 3, 1))
    flat_ref = z_e_nhwc.reshape(-1, embedDim)
    d_ref = jnp.linalg.norm(
        flat_ref[:, None, :] - embedding_weight[None, :, :], axis=-1)
    inds_ref = jnp.argmin(d_ref, axis=-1)
    zq_ref_nhwc = embedding_weight[inds_ref].reshape(N, H, W, embedDim)
    zq_ref_nchw = jnp.transpose(zq_ref_nhwc, (0, 3, 1, 2))
    loss_ref = 1.25 * jnp.mean((z_e_nhwc - zq_ref_nhwc) ** 2, axis=(1, 2, 3))

    assert bool(jnp.all(inds[:, 0] == inds_ref))
    assert jnp.allclose(z_q, zq_ref_nchw, atol=1e-5)
    assert jnp.allclose(vq_loss, loss_ref, atol=1e-5)

    print("KERNEL_OK")
</pallas_src>

<mosaic_0001>
module attributes {stable_mosaic.version = 11 : i64} {
  func.func @_vq_kernel(%arg0: i32, %arg1: i32, %arg2: memref<1x8x128xf32, #tpu.memory_space<vmem>>, %arg3: memref<16x8xf32, #tpu.memory_space<vmem>>, %arg4: memref<8x16xf32, #tpu.memory_space<vmem>>, %arg5: memref<16x1xf32, #tpu.memory_space<vmem>>, %arg6: memref<1x8x128xf32, #tpu.memory_space<vmem>>, %arg7: memref<1x1x128xi32, #tpu.memory_space<vmem>>, %arg8: memref<1x1x128xf32, #tpu.memory_space<vmem>>) attributes {dimension_semantics = [#tpu.dimension_semantics<parallel>, #tpu.dimension_semantics<parallel>], iteration_bounds = array<i64: 2, 1>, scalar_prefetch = 0 : i64, scratch_operands = 0 : i64, tpu.core_type = #tpu.core_type<tc>, window_params = [{transform_indices = @transform_0, window_bounds = array<i64: 1, 8, 128>}, {pipeline_mode = #tpu.pipeline_mode<synchronous>, transform_indices = @transform_1, window_bounds = array<i64: 16, 8>}, {pipeline_mode = #tpu.pipeline_mode<synchronous>, transform_indices = @transform_2, window_bounds = array<i64: 8, 16>}, {pipeline_mode = #tpu.pipeline_mode<synchronous>, transform_indices = @transform_3, window_bounds = array<i64: 16, 1>}, {transform_indices = @transform_4, window_bounds = array<i64: 1, 8, 128>}, {transform_indices = @transform_5, window_bounds = array<i64: 1, 1, 128>}, {transform_indices = @transform_6, window_bounds = array<i64: 1, 1, 128>}]} {
    %c0 = arith.constant 0 : index
    %c0_0 = arith.constant 0 : index
    %c0_1 = arith.constant 0 : index
    %0 = vector.load %arg2[%c0, %c0_0, %c0_1] : memref<1x8x128xf32, #tpu.memory_space<vmem>>, vector<1x8x128xf32>
    %1 = vector.shape_cast %0 : vector<1x8x128xf32> to vector<8x128xf32>
    %c0_2 = arith.constant 0 : index
    %c0_3 = arith.constant 0 : index
    %2 = vector.load %arg3[%c0_2, %c0_3] : memref<16x8xf32, #tpu.memory_space<vmem>>, vector<16x8xf32>
    %c0_4 = arith.constant 0 : index
    %c0_5 = arith.constant 0 : index
    %3 = vector.load %arg4[%c0_4, %c0_5] : memref<8x16xf32, #tpu.memory_space<vmem>>, vector<8x16xf32>
    %cst = arith.constant dense<0.000000e+00> : vector<16x128xf32>
    %4 = tpu.matmul %2, %1, %cst {dimension_numbers = #tpu.dot_dimension_numbers<[1], [0], [0], [1], [0, 0, 1, 1], [], []>} : vector<16x8xf32>, vector<8x128xf32>, vector<16x128xf32> -> vector<16x128xf32>
    %c0_6 = arith.constant 0 : index
    %c0_7 = arith.constant 0 : index
    %5 = vector.load %arg5[%c0_6, %c0_7] : memref<16x1xf32, #tpu.memory_space<vmem>>, vector<16x1xf32>
    %6 = vector.broadcast %5 : vector<16x1xf32> to vector<16x128xf32>
    %7 = arith.subf %6, %4 : vector<16x128xf32>
    %cst_8 = arith.constant dense<0x7F800000> : vector<128xf32>
    %8 = vector.multi_reduction <minimumf>, %7, %cst_8 [0] : vector<16x128xf32> to vector<128xf32>
    %9 = vector.shape_cast %8 : vector<128xf32> to vector<1x128xf32>
    %10 = tpu.iota {dimensions = array<i32: 0>} : vector<16x128xi32>
    %11 = vector.broadcast %9 : vector<1x128xf32> to vector<16x128xf32>
    %12 = arith.cmpf ole, %7, %11 : vector<16x128xf32>
    %c16_i32 = arith.constant 16 : i32
    %13 = vector.broadcast %c16_i32 : i32 to vector<16x128xi32>
    %14 = arith.select %12, %10, %13 : vector<16x128xi1>, vector<16x128xi32>
    %cst_9 = arith.constant dense<2147483647> : vector<128xi32>
    %15 = vector.multi_reduction <minsi>, %14, %cst_9 [0] : vector<16x128xi32> to vector<128xi32>
    %16 = vector.shape_cast %15 : vector<128xi32> to vector<1x128xi32>
    %17 = vector.shape_cast %16 : vector<1x128xi32> to vector<1x1x128xi32>
    %c0_10 = arith.constant 0 : index
    %c0_11 = arith.constant 0 : index
    %c0_12 = arith.constant 0 : index
    %18 = vector.load %arg7[%c0_10, %c0_11, %c0_12] : memref<1x1x128xi32, #tpu.memory_space<vmem>>, vector<1x1x128xi32>
    tpu.vector_store %arg7[%c0_10, %c0_11, %c0_12], %17 {strides = array<i32>} : memref<1x1x128xi32, #tpu.memory_space<vmem>>, vector<1x1x128xi32>,
    %19 = vector.broadcast %16 : vector<1x128xi32> to vector<16x128xi32>
    %20 = arith.cmpi eq, %10, %19 : vector<16x128xi32>
    %21 = arith.extui %20 : vector<16x128xi1> to vector<16x128xi32>
    %22 = arith.sitofp %21 : vector<16x128xi32> to vector<16x128xf32>
    %cst_13 = arith.constant dense<0.000000e+00> : vector<8x128xf32>
    %23 = tpu.matmul %3, %22, %cst_13 {dimension_numbers = #tpu.dot_dimension_numbers<[1], [0], [0], [1], [0, 0, 1, 1], [], []>} : vector<8x16xf32>, vector<16x128xf32>, vector<8x128xf32> -> vector<8x128xf32>
    %24 = vector.shape_cast %23 : vector<8x128xf32> to vector<1x8x128xf32>
    %c0_14 = arith.constant 0 : index
    %c0_15 = arith.constant 0 : index
    %c0_16 = arith.constant 0 : index
    %25 = vector.load %arg6[%c0_14, %c0_15, %c0_16] : memref<1x8x128xf32, #tpu.memory_space<vmem>>, vector<1x8x128xf32>
    tpu.vector_store %arg6[%c0_14, %c0_15, %c0_16], %24 {strides = array<i32>} : memref<1x8x128xf32, #tpu.memory_space<vmem>>, vector<1x8x128xf32>,
    %26 = arith.subf %1, %23 : vector<8x128xf32>
    %27 = arith.mulf %26, %26 : vector<8x128xf32>
    %cst_17 = arith.constant dense<0.000000e+00> : vector<128xf32>
    %28 = vector.multi_reduction <add>, %27, %cst_17 [0] : vector<8x128xf32> to vector<128xf32>
    %29 = vector.shape_cast %28 : vector<128xf32> to vector<1x128xf32>
    %30 = vector.shape_cast %29 : vector<1x128xf32> to vector<1x1x128xf32>
    %c0_18 = arith.constant 0 : index
    %c0_19 = arith.constant 0 : index
    %c0_20 = arith.constant 0 : index
    %31 = vector.load %arg8[%c0_18, %c0_19, %c0_20] : memref<1x1x128xf32, #tpu.memory_space<vmem>>, vector<1x1x128xf32>
    tpu.vector_store %arg8[%c0_18, %c0_19, %c0_20], %30 {strides = array<i32>} : memref<1x1x128xf32, #tpu.memory_space<vmem>>, vector<1x1x128xf32>,
    return
  }
  func.func @transform_0(%arg0: i32, %arg1: i32) -> (i32, i32, i32) {
    %c0_i32 = arith.constant 0 : i32
    %c0_i32_0 = arith.constant 0 : i32
    return %arg0, %c0_i32, %arg1 : i32, i32, i32
  }
  func.func @transform_1(%arg0: i32, %arg1: i32) -> (i32, i32) {
    %c0_i32 = arith.constant 0 : i32
    %c0_i32_0 = arith.constant 0 : i32
    %c0_i32_1 = arith.constant 0 : i32
    return %c0_i32, %c0_i32_0 : i32, i32
  }
  func.func @transform_2(%arg0: i32, %arg1: i32) -> (i32, i32) {
    %c0_i32 = arith.constant 0 : i32
    %c0_i32_0 = arith.constant 0 : i32
    %c0_i32_1 = arith.constant 0 : i32
    return %c0_i32, %c0_i32_0 : i32, i32
  }
  func.func @transform_3(%arg0: i32, %arg1: i32) -> (i32, i32) {
    %c0_i32 = arith.constant 0 : i32
    %c0_i32_0 = arith.constant 0 : i32
    %c0_i32_1 = arith.constant 0 : i32
    return %c0_i32, %c0_i32_0 : i32, i32
  }
  func.func @transform_4(%arg0: i32, %arg1: i32) -> (i32, i32, i32) {
    %c0_i32 = arith.constant 0 : i32
    %c0_i32_0 = arith.constant 0 : i32
    return %arg0, %c0_i32, %arg1 : i32, i32, i32
  }
  func.func @transform_5(%arg0: i32, %arg1: i32) -> (i32, i32, i32) {
    %c0_i32 = arith.constant 0 : i32
    %c0_i32_0 = arith.constant 0 : i32
    return %arg0, %c0_i32, %arg1 : i32, i32, i32
  }
  func.func @transform_6(%arg0: i32, %arg1: i32) -> (i32, i32, i32) {
    %c0_i32 = arith.constant 0 : i32
    %c0_i32_0 = arith.constant 0 : i32
    return %arg0, %c0_i32, %arg1 : i32, i32, i32
  }
}

</mosaic_0001>

<bundles_post_ra>
// kernel: vq_straight_through.1
= control target key start
LH: loop header
LB: loop body
LE: loop exit
PB: predicated region body
PF: predicated region fallthrough
CT: control target
= control target key end

     0   :  { %s802_s21 = smov 0   ;;  %s804_s22 = smov 0   ;;  %s865_s0 = inlined_call_operand.vmem [shape: f32[2,8,128], index: 0, kind: input, shape index: {}]   ;;  %s866_s1 = inlined_call_operand.vmem [shape: f32[16,8], index: 1, kind: input, shape index: {}]   ;;  %s867_s2 = inlined_call_operand.vmem [shape: f32[8,16], index: 2, kind: input, shape index: {}]   ;;  %s868_s3 = inlined_call_operand.vmem [shape: f32[16,1], index: 3, kind: input, shape index: {}]   ;;  %s869_s4 = inlined_call_operand.vmem [shape: f32[2,8,128], index: 4, kind: output, shape index: {0}]   ;;  %s870_s5 = inlined_call_operand.vmem [shape: s32[2,1,128], index: 5, kind: output, shape index: {1}]   ;;  %s871_s6 = inlined_call_operand.vmem [shape: f32[2,1,128], index: 6, kind: output, shape index: {2}]  }
   0x1   :  { %s806_s23 = smov 0  }
   0x2 LB: > { %s29_s24 = sadd.s32 1, %s756_s22  ;;  %p675_p0 = scmp.ge.s32.totalorder %s760_s23, 1  ;;  %s760_s23 = sphi %s806_s23, %s17_s23   ;;  %s756_s22 = sphi %s804_s22, %s873_s22   ;;  %s752_s21 = sphi %s802_s21, %s872_s21  }
   0x3   : > { %p31_p1 = scmp.ge.s32.totalorder %s29_s24, 2  ;;  %p239_p2 = scmp.lt.s32.totalorder %s760_s23, 3 }
   0x5   : > { %s875_s24 = smov (%p31_p1, %s29_s24), 0  ;;  %p240_p3 = pnand %p675_p0, %p239_p2 }
   0x6   : > { %p285_p4 = scmp.lt.s32.totalorder (!%p240_p3), %s752_s21, 1  ;;  %v312_v0 = vld [vmem:[%s866_s1] sm:$0xff] (!%p240_p3)  ;;  %vm315_vm0 = vcmask (!%p240_p3), 64512   ;;  %v762_v2 = vmov (!%p240_p3), 0   ;;  %v398_v3 = vld [vmem:[%s868_s3 + $0x8] sm:$0xff] (!%p240_p3)  ;;  %v763_v6 = vmov (!%p240_p3), 0.0|0.0   ;;  %v418_v16 = vlaneseq (!%p240_p3) }
   0x7   : > { %243 = sbr.rel (%p240_p3) target bundleno = 499 (0x1f3), region = 36  ;;  %v397_v1 = vld [vmem:[%s868_s3] sm:$0xff] (!%p240_p3)  ;;  %695 = vmatprep.mubr.msk.f32.mxu0 (!%p240_p3), %vm315_vm0, %v312_v0  ;;  %737 = vset.pattern.permute.xlu0 (!%p240_p3), %v762_v2  ;;  %v313_v5 = vld [vmem:[%s866_s1 + $0x8] sm:$0xff] (!%p240_p3)  ;;  %vm764_vm1 = vmmov (!%p240_p3), 0   ;;  %v765_v7 = vmov (!%p240_p3), 0.0   ;;  %vm443_vm11 = vcmask (!%p240_p3), 130048  }
   0x8   : > { %401 = vperm.xlu0 (!%p240_p3), %737, %v397_v1   ;;  %705 = vmatprep.subr.bf16.mxu1 (!%p240_p3), %v763_v6  ;;  %v419_v19 = vshrl.u32 (!%p240_p3), %v418_v16, 7  ;;  %v766_v33 = vmov (!%p240_p3), 1.0|1.0   ;;  %v314_v34 = vld [vmem:[%s867_s2] sm:$0xff] (!%p240_p3) }
   0x9   : > { %702 = vmatprep.mubr.msk.f32.mxu1 (!%p240_p3), %vm764_vm1, %v765_v7 }
   0xa   : > { %v420_v22 = vadd.s32 (!%p240_p3), 8, %v419_v19 }
   0xc   : > { %406 = vperm.xlu0 (!%p240_p3), %737, %v398_v3  }
   0xe   : > { %s877_s21 = smov (!%p285_p4, %s752_s21), 1 }
   0xf   : > { %s676_s7 = sshll.u32 %s877_s21, 3  ;;  %s304_s15 = scalar_lea.vmem %s870_s5, %s877_s21 }
  0x10   : > { %s291_s10 = scalar_lea.vmem %s865_s0, %s676_s7  ;;  %s298_s20 = scalar_lea.vmem %s869_s4, %s676_s7 }
  0x11   : > { %v311_v4 = vld [vmem:[%s291_s10] sm:$0xff]  ;;  %s310_s27 = scalar_lea.vmem %s871_s6, %s877_s21 }
  0x12   : > { %693 = vmatprep.subr.mxu0 %v311_v4 }
  0x13   : > { %694 = vmatpush3.msra.mxu0 %v311_v4 }
  0x14   : > { %696 = vmatmul.mubr.msk.f32.vlgmr.msra.gmra.mrb[0].mxu0 %vm315_vm0, %v313_v5 }
  0x87   : > { %v402_v8 = vpop.permute.xlu0 %401 }
  0x8b   : > { %v407_v9 = vpop.permute.xlu0 %406 }
  0xe7   : > { %v697_v10 = vpop.f32.mrb[0].mxu0 }
  0xe8   : > { %v410_v11 = vsub.f32 %v407_v9, %v697_v10  ;;  %v388_v12 = vpop.f32.mrb[1].mxu0 }
  0xe9   : > { %v409_v13 = vsub.f32 %v402_v8, %v388_v12 }
  0xeb   : > { %v411_v14 = vmin.f32 %v409_v13, %v410_v11 }
  0xed   : > { %v412_v15 = vrot.slane %v411_v14, 4 }
  0xef   : > { %v413_v17 = vmin.f32 %v411_v14, %v412_v15 }
  0xf1   : > { %v414_v18 = vrot.slane %v413_v17, 2 }
  0xf3   : > { %v415_v20 = vmin.f32 %v413_v17, %v414_v18 }
  0xf5   : > { %v416_v21 = vrot.slane %v415_v20, 1 }
  0xf7   : > { %v417_v23 = vmin.f32 %v415_v20, %v416_v21 }
  0xf9   : > { %vm421_vm2 = vcmp.le.f32.partialorder %v409_v13, %v417_v23  ;;  %vm422_vm3 = vcmp.le.f32.partialorder %v410_v11, %v417_v23 }
  0xfa   : > { %v423_v24 = vsel %vm421_vm2, %v419_v19, 16  ;;  %v424_v25 = vsel %vm422_vm3, %v420_v22, 16 }
  0xfb   : > { %vm425_vm4 = vcmp.lt.s32.totalorder %v423_v24, %v424_v25 }
  0xfc   : > { %v426_v26 = vsel %vm425_vm4, %v423_v24, %v424_v25 }
  0xfd   : > { %v427_v27 = vrot.slane %v426_v26, 4 }
  0xff   : > { %vm428_vm5 = vcmp.lt.s32.totalorder %v426_v26, %v427_v27 }
 0x100   : > { %v429_v28 = vsel %vm428_vm5, %v426_v26, %v427_v27 }
 0x101   : > { %v430_v29 = vrot.slane %v429_v28, 2 }
 0x103   : > { %vm431_vm6 = vcmp.lt.s32.totalorder %v429_v28, %v430_v29 }
 0x104   : > { %v432_v30 = vsel %vm431_vm6, %v429_v28, %v430_v29 }
 0x105   : > { %v433_v31 = vrot.slane %v432_v30, 1 }
 0x107   : > { %vm434_vm7 = vcmp.lt.s32.totalorder %v432_v30, %v433_v31 }
 0x108   : > { %v435_v32 = vsel %vm434_vm7, %v432_v30, %v433_v31 }
 0x109   : > { %436 = vst [vmem:[%s304_s15] sm:$0x1] %v435_v32  ;;  %vm437_vm8 = vcmp.eq.s32.totalorder %v419_v19, %v435_v32  ;;  %vm438_vm9 = vcmp.eq.s32.totalorder %v420_v22, %v435_v32 }
 0x10a   : > { %vm706_vm10 = vmpackc.low %vm438_vm9, %vm437_vm8 }
 0x10b   : > { %707 = vmatpush3.bf16.msk.msra.mxu1 %vm706_vm10, %v766_v33 }
 0x10e   : > { %703 = vmatmul.mubr.msk.f32.vlgmr.msra.gmra.mrb[0].mxu1 %vm443_vm11, %v314_v34 }
 0x1e1   : > { %v513_v35 = vpop.f32.mrb[0].mxu1 }
 0x1e2   : > { %517 = vst [vmem:[%s298_s20] sm:$0xff] %v513_v35  ;;  %v518_v36 = vsub.f32 %v311_v4, %v513_v35  ;;  %v704_v37 = vpop.f32.mrb[1].mxu1 }
 0x1e4   : > { %v519_v38 = vmul.f32 %v518_v36, %v518_v36 }
 0x1e6   : > { %v520_v39 = vrot.slane %v519_v38, 4 }
 0x1e8   : > { %v521_v40 = vadd.f32 %v520_v39, %v519_v38 }
 0x1ea   : > { %v522_v41 = vrot.slane %v521_v40, 2 }
 0x1ec   : > { %v523_v42 = vadd.f32 %v522_v41, %v521_v40 }
 0x1ee   : > { %v524_v43 = vrot.slane %v523_v42, 1 }
 0x1f0   : > { %v525_v44 = vadd.f32 %v524_v43, %v523_v42 }
 0x1f2   : > { %526 = vst [vmem:[%s310_s27] sm:$0x1] %v525_v44 }
 0x1f3 PF: > { %s17_s23 = sadd.s32 1, %s760_s23   ;;  %s872_s21 = smov %s756_s22 }
 0x1f4   : > { %p14_p5 = scmp.ge.s32.totalorder %s17_s23, 4   ;;  %s873_s22 = smov %s875_s24 }
 0x1f6   :  { %16 = sbr.rel (!%p14_p5) target bundleno = 2 (0x2), region = 90 }

</bundles_post_ra>
